<compile_context>
chip_gen: v5e
topology: v5e:2x2
jax: 0.10.0
libtpu: 0.0.40
codegen_flags: <defaults>
</compile_context>

<pallas_src>
import functools
import math

import jax
import jax.numpy as jnp
from jax.experimental import pallas as pl
from jax.experimental.pallas import tpu as pltpu

_SQRT_2_OVER_PI = 0.7978845608028654


def _gelu(x):
    # tanh-approximate GELU (same function used in kernel and reference).
    return 0.5 * x * (1.0 + jnp.tanh(_SQRT_2_OVER_PI * (x + 0.044715 * x * x * x)))


# ----------------------------------------------------------------------------
# Pallas kernel: one batch-block (bb images) per grid step
# ----------------------------------------------------------------------------
def _regressor_kernel(x_ref, w1_ref, b1_ref, vmat_ref, sc_ref, out_ref, *, H, W):
    """RegressorBlock.forward for a block of bb images.

    x_ref   : (bb, C, H*W) raw input block, spatial flattened H-major (VMEM)
    w1_ref  : (C, 9*C)     fused conv1 weight, k = (kh*3+kw)*C + c (VMEM, bf16)
    b1_ref  : (C, 1)       conv1 bias (VMEM, f32)
    vmat_ref: (C, H*W)     folded conv2∘linear1 reduction weight (VMEM, f32)
    sc_ref  : (3,)         [bias0, linear2_weight, linear2_bias] (SMEM)
    out_ref : (bb, 1, 1)   per-image scalar output block (VMEM)
    """
    bb, C, HW = x_ref.shape
    assert HW == H * W

    # GELU exactly once per input element; fold batch into sublanes (bb*C rows)
    # so the elementwise / roll / select work runs on full(er) vregs.
    a2 = _gelu(x_ref[...].astype(jnp.float32)).reshape(bb * C, HW)

    # Circular W-wrap masks, hoisted out of the tap loop (JAX does not CSE
    # broadcast/compare).  W is a power of two here so % W lowers cheaply.
    col = jax.lax.broadcasted_iota(jnp.int32, (bb * C, HW), 1) % W
    edge_l = col == 0
    edge_r = col == (W - 1)

    # Build the 9 circular 3x3 taps.  tap[r, h*W+w] == a2[r, (h+dh)%H, (w+dw)%W]:
    # the H-wrap is exact under a flat (H*W) lane roll; the W-wrap needs a select.
    taps = []                                   # list of (bb*C, HW) bf16, t-major
    for dh in (-1, 0, 1):
        for dw in (-1, 0, 1):
            s_in = (-(dh * W + dw)) % HW                       # interior columns
            t = pltpu.roll(a2, s_in, axis=1) if s_in else a2
            if dw != 0:
                s_wr = (-(dh * W + dw * (1 - W))) % HW         # W-wrapped columns
                t_wr = pltpu.roll(a2, s_wr, axis=1) if s_wr else a2
                t = jnp.where(edge_r if dw == 1 else edge_l, t_wr, t)
            taps.append(t.astype(jnp.bfloat16))

    w1 = w1_ref[...]                                            # (C, 9C) bf16
    b1 = b1_ref[...]                                            # (C, 1)
    vmat = vmat_ref[...]                                        # (C, HW)

    # Per-image: one fused (C,9C)x(9C,HW) MXU matmul, then the folded
    # conv2+linear1 multiply-reduce, GELU and linear2.
    for b in range(bb):
        stack_b = jnp.concatenate([t[b * C:(b + 1) * C] for t in taps],
                                  axis=0)                       # (9C, HW) bf16
        h1 = jnp.dot(w1, stack_b,
                     preferred_element_type=jnp.float32) + b1   # (C, HW)
        g1 = _gelu(h1)
        s = jnp.sum(g1 * vmat, axis=1, keepdims=True)           # (C, 1)
        s = jnp.sum(s, axis=0, keepdims=True) + sc_ref[0]       # (1, 1)
        y = _gelu(s) * sc_ref[1] + sc_ref[2]                    # (1, 1)
        out_ref[b] = y


# ----------------------------------------------------------------------------
# Generation-aware batch blocking
# ----------------------------------------------------------------------------
def _num_tensorcores() -> int:
    """Best-effort count of TensorCores behind one JAX device."""
    try:
        kind = jax.devices()[0].device_kind.lower()
    except Exception:  # pragma: no cover - conservative fallback
        return 1
    if "lite" in kind or "v5e" in kind or "v6e" in kind or "v6 lite" in kind \
            or "v2" in kind or "v3" in kind:
        return 1
    if "v4" in kind or "v5p" in kind or "v7" in kind or "7x" in kind:
        return 2
    return 1


def _pick_batch_block(B: int, n_tc: int) -> int:
    """Fold batch into one step on single-TC chips; keep >=n_tc steps on dual-TC."""
    if n_tc <= 1:
        return B
    target = max(1, (B + n_tc - 1) // n_tc)
    for bb in range(target, 0, -1):
        if B % bb == 0:
            return bb
    return 1


# ----------------------------------------------------------------------------
# Glue: parameter setup and pallas_call wrapper
# ----------------------------------------------------------------------------
def init_params(key, mid_channels, mid_size, mlp_max=4096, out_dim=1):
    inter_f = round(mlp_max / mid_size ** 2)
    vec = mid_size ** 2 * inter_f
    ks = jax.random.split(key, 8)

    def u(k, shape, fan_in):
        bnd = 1.0 / math.sqrt(fan_in)
        return jax.random.uniform(k, shape, jnp.float32, -bnd, bnd)

    return dict(
        conv1_w=u(ks[0], (mid_channels, mid_channels, 3, 3), mid_channels * 9),
        conv1_b=u(ks[1], (mid_channels,), mid_channels * 9),
        conv2_w=u(ks[2], (inter_f, mid_channels, 1, 1), mid_channels),
        conv2_b=u(ks[3], (inter_f,), mid_channels),
        lin1_w=u(ks[4], (out_dim, vec), vec),
        lin1_b=u(ks[5], (out_dim,), vec),
        lin2_w=u(ks[6], (out_dim, out_dim), out_dim),
        lin2_b=u(ks[7], (out_dim,), out_dim),
    )


def regressor_block_forward(x, params):
    """Pallas implementation of RegressorBlock.forward (x: NCHW float32)."""
    B, C, H, W = x.shape
    out_dim = params["lin1_w"].shape[0]
    assert out_dim == 1, "kernel specialized to the default out_dim=1"
    F = params["conv2_w"].shape[0]
    HW = H * W

    xr = x.reshape(B, C, HW)                                  # raw x, no im2col

    # --- weight-only transforms (constant-folded under jit with static params) ---
    # conv1 (O, C, 3, 3) -> fused (O, 9C), k = (kh*3 + kw)*C + c; bf16 MXU operand.
    w1f = jnp.transpose(params["conv1_w"], (0, 2, 3, 1)).reshape(C, 9 * C)
    w1f = w1f.astype(jnp.bfloat16)
    b1c = params["conv1_b"].reshape(C, 1).astype(jnp.float32)
    # Fold conv2 (1x1) + linear1 (out_dim == 1): exact, no nonlinearity between.
    w2r = params["conv2_w"].reshape(F, C)
    wl1 = params["lin1_w"].reshape(out_dim, F, HW)[0]         # torch flatten order
    vmat = jnp.einsum("fc,fp->cp", w2r, wl1).astype(jnp.float32)       # (C, HW)
    bias0 = jnp.sum(params["conv2_b"] * jnp.sum(wl1, axis=-1)) + params["lin1_b"][0]
    scalars = jnp.stack([bias0,
                         params["lin2_w"][0, 0],
                         params["lin2_b"][0]]).astype(jnp.float32)     # (3,)

    # --- grid: batch blocks, sized per TPU generation ---
    bb = _pick_batch_block(B, _num_tensorcores())
    grid = (B // bb,)

    # VMEM guard (v7x only has 64 MiB physical): resident weights + double-
    # buffered x block + gelu'd copy + bf16 tap stack + working arrays.
    est_vmem = 4 * (3 * bb * C * HW        # x (double-buffered) + gelu'd copy
                    + 5 * bb * C * HW      # 9-tap bf16 stack + temps
                    + 3 * C * HW           # vmat + h1/g1 working set
                    + 16 * C * C) + (1 << 20)
    vmem_limit = int(min(64 * 1024 * 1024, max(32 * 1024 * 1024, est_vmem)))

    kernel = functools.partial(_regressor_kernel, H=H, W=W)

    out = pl.pallas_call(
        kernel,
        out_shape=jax.ShapeDtypeStruct((B, 1, 1), jnp.float32),
        grid=grid,
        in_specs=[
            pl.BlockSpec((bb, C, HW), lambda b: (b, 0, 0)),   # bb images / step
            pl.BlockSpec((C, 9 * C), lambda b: (0, 0)),       # weights: resident
            pl.BlockSpec((C, 1), lambda b: (0, 0)),
            pl.BlockSpec((C, HW), lambda b: (0, 0)),
            pl.BlockSpec(memory_space=pltpu.MemorySpace.SMEM),  # 3 scalars
        ],
        out_specs=pl.BlockSpec((bb, 1, 1), lambda b: (b, 0, 0)),
        compiler_params=pltpu.CompilerParams(
            dimension_semantics=("parallel",),
            vmem_limit_bytes=vmem_limit),
    )(xr, w1f, b1c, vmat, scalars)
    return out.reshape(B, out_dim)


# ----------------------------------------------------------------------------
# Pure-JAX reference (mirrors the PyTorch forward, full f32)
# ----------------------------------------------------------------------------
def reference_forward(x, p):
    a = _gelu(x)
    a = jnp.pad(a, ((0, 0), (0, 0), (1, 1), (1, 1)), mode="wrap")
    h = jax.lax.conv_general_dilated(
        a, p["conv1_w"], window_strides=(1, 1), padding="VALID",
        dimension_numbers=("NCHW", "OIHW", "NCHW"))
    h = h + p["conv1_b"][None, :, None, None]
    h = _gelu(h)
    h = jnp.einsum("fc,bchw->bfhw", p["conv2_w"][:, :, 0, 0], h)
    h = h + p["conv2_b"][None, :, None, None]
    v = h.reshape(h.shape[0], -1)
    z = _gelu(v @ p["lin1_w"].T + p["lin1_b"])
    return z @ p["lin2_w"].T + p["lin2_b"]


if __name__ == "__main__":
    key = jax.random.PRNGKey(0)
    B, mid_channels, mid_size = 2, 4, 16   # -> intermediate_filters=16, vector_size=4096
    kx, kp = jax.random.split(key)
    x = jax.random.normal(kx, (B, mid_channels, mid_size, mid_size), jnp.float32)
    params = init_params(kp, mid_channels, mid_size)

    y = regressor_block_forward(x, params)
    jax.block_until_ready(y)

    y_ref = reference_forward(x, params)
    assert y.shape == (B, 1)
    # bf16 MXU operands (f32 accumulation) -> slightly wider tolerance than the
    # pure-f32 reference; K=36 contraction keeps the error ~1e-3 absolute.
    assert jnp.allclose(y, y_ref, rtol=5e-3, atol=5e-3), (y, y_ref)
    print("KERNEL_OK")
</pallas_src>

<mosaic_0001>
module attributes {stable_mosaic.version = 11 : i64} {
  func.func @_regressor_kernel(%arg0: i32, %arg1: memref<2x4x256xf32, #tpu.memory_space<vmem>>, %arg2: memref<4x36xbf16, #tpu.memory_space<vmem>>, %arg3: memref<4x1xf32, #tpu.memory_space<vmem>>, %arg4: memref<4x256xf32, #tpu.memory_space<vmem>>, %arg5: memref<3xf32, #tpu.memory_space<smem>>, %arg6: memref<2x1x1xf32, #tpu.memory_space<vmem>>) attributes {dimension_semantics = [#tpu.dimension_semantics<parallel>], iteration_bounds = array<i64: 1>, scalar_prefetch = 0 : i64, scratch_operands = 0 : i64, tpu.core_type = #tpu.core_type<tc>, window_params = [{transform_indices = @transform_0, window_bounds = array<i64: 2, 4, 256>}, {pipeline_mode = #tpu.pipeline_mode<synchronous>, transform_indices = @transform_1, window_bounds = array<i64: 4, 36>}, {pipeline_mode = #tpu.pipeline_mode<synchronous>, transform_indices = @transform_2, window_bounds = array<i64: 4, 1>}, {pipeline_mode = #tpu.pipeline_mode<synchronous>, transform_indices = @transform_3, window_bounds = array<i64: 4, 256>}, {transform_indices = @transform_4, window_bounds = array<i64: 3>}, {transform_indices = @transform_5, window_bounds = array<i64: 2, 1, 1>}]} {
    %c0 = arith.constant 0 : index
    %c0_0 = arith.constant 0 : index
    %c0_1 = arith.constant 0 : index
    %0 = vector.load %arg1[%c0, %c0_0, %c0_1] : memref<2x4x256xf32, #tpu.memory_space<vmem>>, vector<2x4x256xf32>
    %cst = arith.constant 5.000000e-01 : f32
    %1 = vector.broadcast %cst : f32 to vector<2x4x256xf32>
    %2 = arith.mulf %1, %0 : vector<2x4x256xf32>
    %cst_2 = arith.constant 4.471500e-02 : f32
    %3 = vector.broadcast %cst_2 : f32 to vector<2x4x256xf32>
    %4 = arith.mulf %3, %0 : vector<2x4x256xf32>
    %5 = arith.mulf %4, %0 : vector<2x4x256xf32>
    %6 = arith.mulf %5, %0 : vector<2x4x256xf32>
    %7 = arith.addf %0, %6 : vector<2x4x256xf32>
    %cst_3 = arith.constant 0.797884583 : f32
    %8 = vector.broadcast %cst_3 : f32 to vector<2x4x256xf32>
    %9 = arith.mulf %8, %7 : vector<2x4x256xf32>
    %10 = math.tanh %9 : vector<2x4x256xf32>
    %cst_4 = arith.constant 1.000000e+00 : f32
    %11 = vector.broadcast %cst_4 : f32 to vector<2x4x256xf32>
    %12 = arith.addf %11, %10 : vector<2x4x256xf32>
    %13 = arith.mulf %2, %12 : vector<2x4x256xf32>
    %14 = vector.shape_cast %13 : vector<2x4x256xf32> to vector<8x256xf32>
    %15 = tpu.iota {dimensions = array<i32: 1>} : vector<8x256xi32>
    %c16_i32 = arith.constant 16 : i32
    %c0_i32 = arith.constant 0 : i32
    %16 = arith.cmpi eq, %c16_i32, %c0_i32 : i32
    %c1_i32 = arith.constant 1 : i32
    %17 = arith.select %16, %c1_i32, %c16_i32 : i32
    %18 = vector.broadcast %17 : i32 to vector<8x256xi32>
    %19 = arith.remsi %15, %18 : vector<8x256xi32>
    %c0_i32_5 = arith.constant 0 : i32
    %20 = vector.broadcast %c0_i32_5 : i32 to vector<8x256xi32>
    %21 = arith.cmpi ne, %19, %20 : vector<8x256xi32>
    %c0_i32_6 = arith.constant 0 : i32
    %22 = vector.broadcast %c0_i32_6 : i32 to vector<8x256xi32>
    %23 = arith.cmpi slt, %19, %22 : vector<8x256xi32>
    %c0_i32_7 = arith.constant 0 : i32
    %24 = arith.cmpi slt, %17, %c0_i32_7 : i32
    %25 = vector.broadcast %24 : i1 to vector<8x256xi1>
    %26 = vector.broadcast %25 : vector<8x256xi1> to vector<8x256xi1>
    %27 = arith.xori %23, %26 : vector<8x256xi1>
    %28 = arith.andi %27, %21 : vector<8x256xi1>
    %29 = vector.broadcast %17 : i32 to vector<8x256xi32>
    %30 = arith.addi %19, %29 : vector<8x256xi32>
    %31 = arith.select %28, %30, %19 : vector<8x256xi1>, vector<8x256xi32>
    %c0_i32_8 = arith.constant 0 : i32
    %32 = vector.broadcast %c0_i32_8 : i32 to vector<8x256xi32>
    %33 = arith.cmpi eq, %31, %32 : vector<8x256xi32>
    %c15_i32 = arith.constant 15 : i32
    %34 = vector.broadcast %c15_i32 : i32 to vector<8x256xi32>
    %35 = arith.cmpi eq, %31, %34 : vector<8x256xi32>
    %c17_i32 = arith.constant 17 : i32
    %36 = tpu.dynamic_rotate %14 by %c17_i32 dim 1 : vector<8x256xf32>, i32 -> vector<8x256xf32>
    %c1_i32_9 = arith.constant 1 : i32
    %37 = tpu.dynamic_rotate %14 by %c1_i32_9 dim 1 : vector<8x256xf32>, i32 -> vector<8x256xf32>
    %38 = arith.select %33, %37, %36 : vector<8x256xi1>, vector<8x256xf32>
    %39 = arith.truncf %38 : vector<8x256xf32> to vector<8x256xbf16>
    %c16_i32_10 = arith.constant 16 : i32
    %40 = tpu.dynamic_rotate %14 by %c16_i32_10 dim 1 : vector<8x256xf32>, i32 -> vector<8x256xf32>
    %41 = arith.truncf %40 : vector<8x256xf32> to vector<8x256xbf16>
    %c15_i32_11 = arith.constant 15 : i32
    %42 = tpu.dynamic_rotate %14 by %c15_i32_11 dim 1 : vector<8x256xf32>, i32 -> vector<8x256xf32>
    %c31_i32 = arith.constant 31 : i32
    %43 = tpu.dynamic_rotate %14 by %c31_i32 dim 1 : vector<8x256xf32>, i32 -> vector<8x256xf32>
    %44 = arith.select %35, %43, %42 : vector<8x256xi1>, vector<8x256xf32>
    %45 = arith.truncf %44 : vector<8x256xf32> to vector<8x256xbf16>
    %c1_i32_12 = arith.constant 1 : i32
    %46 = tpu.dynamic_rotate %14 by %c1_i32_12 dim 1 : vector<8x256xf32>, i32 -> vector<8x256xf32>
    %c241_i32 = arith.constant 241 : i32
    %47 = tpu.dynamic_rotate %14 by %c241_i32 dim 1 : vector<8x256xf32>, i32 -> vector<8x256xf32>
    %48 = arith.select %33, %47, %46 : vector<8x256xi1>, vector<8x256xf32>
    %49 = arith.truncf %48 : vector<8x256xf32> to vector<8x256xbf16>
    %50 = arith.truncf %14 : vector<8x256xf32> to vector<8x256xbf16>
    %c255_i32 = arith.constant 255 : i32
    %51 = tpu.dynamic_rotate %14 by %c255_i32 dim 1 : vector<8x256xf32>, i32 -> vector<8x256xf32>
    %c15_i32_13 = arith.constant 15 : i32
    %52 = tpu.dynamic_rotate %14 by %c15_i32_13 dim 1 : vector<8x256xf32>, i32 -> vector<8x256xf32>
    %53 = arith.select %35, %52, %51 : vector<8x256xi1>, vector<8x256xf32>
    %54 = arith.truncf %53 : vector<8x256xf32> to vector<8x256xbf16>
    %c241_i32_14 = arith.constant 241 : i32
    %55 = tpu.dynamic_rotate %14 by %c241_i32_14 dim 1 : vector<8x256xf32>, i32 -> vector<8x256xf32>
    %c225_i32 = arith.constant 225 : i32
    %56 = tpu.dynamic_rotate %14 by %c225_i32 dim 1 : vector<8x256xf32>, i32 -> vector<8x256xf32>
    %57 = arith.select %33, %56, %55 : vector<8x256xi1>, vector<8x256xf32>
    %58 = arith.truncf %57 : vector<8x256xf32> to vector<8x256xbf16>
    %c240_i32 = arith.constant 240 : i32
    %59 = tpu.dynamic_rotate %14 by %c240_i32 dim 1 : vector<8x256xf32>, i32 -> vector<8x256xf32>
    %60 = arith.truncf %59 : vector<8x256xf32> to vector<8x256xbf16>
    %c239_i32 = arith.constant 239 : i32
    %61 = tpu.dynamic_rotate %14 by %c239_i32 dim 1 : vector<8x256xf32>, i32 -> vector<8x256xf32>
    %c255_i32_15 = arith.constant 255 : i32
    %62 = tpu.dynamic_rotate %14 by %c255_i32_15 dim 1 : vector<8x256xf32>, i32 -> vector<8x256xf32>
    %63 = arith.select %35, %62, %61 : vector<8x256xi1>, vector<8x256xf32>
    %64 = arith.truncf %63 : vector<8x256xf32> to vector<8x256xbf16>
    %c0_16 = arith.constant 0 : index
    %c0_17 = arith.constant 0 : index
    %65 = vector.load %arg2[%c0_16, %c0_17] : memref<4x36xbf16, #tpu.memory_space<vmem>>, vector<4x36xbf16>
    %c0_18 = arith.constant 0 : index
    %c0_19 = arith.constant 0 : index
    %66 = vector.load %arg3[%c0_18, %c0_19] : memref<4x1xf32, #tpu.memory_space<vmem>>, vector<4x1xf32>
    %c0_20 = arith.constant 0 : index
    %c0_21 = arith.constant 0 : index
    %67 = vector.load %arg4[%c0_20, %c0_21] : memref<4x256xf32, #tpu.memory_space<vmem>>, vector<4x256xf32>
    %68 = vector.extract_strided_slice %39 {offsets = [0, 0], sizes = [4, 256], strides = [1, 1]} : vector<8x256xbf16> to vector<4x256xbf16>
    %69 = vector.extract_strided_slice %41 {offsets = [0, 0], sizes = [4, 256], strides = [1, 1]} : vector<8x256xbf16> to vector<4x256xbf16>
    %70 = vector.extract_strided_slice %45 {offsets = [0, 0], sizes = [4, 256], strides = [1, 1]} : vector<8x256xbf16> to vector<4x256xbf16>
    %71 = vector.extract_strided_slice %49 {offsets = [0, 0], sizes = [4, 256], strides = [1, 1]} : vector<8x256xbf16> to vector<4x256xbf16>
    %72 = vector.extract_strided_slice %50 {offsets = [0, 0], sizes = [4, 256], strides = [1, 1]} : vector<8x256xbf16> to vector<4x256xbf16>
    %73 = vector.extract_strided_slice %54 {offsets = [0, 0], sizes = [4, 256], strides = [1, 1]} : vector<8x256xbf16> to vector<4x256xbf16>
    %74 = vector.extract_strided_slice %58 {offsets = [0, 0], sizes = [4, 256], strides = [1, 1]} : vector<8x256xbf16> to vector<4x256xbf16>
    %75 = vector.extract_strided_slice %60 {offsets = [0, 0], sizes = [4, 256], strides = [1, 1]} : vector<8x256xbf16> to vector<4x256xbf16>
    %76 = vector.extract_strided_slice %64 {offsets = [0, 0], sizes = [4, 256], strides = [1, 1]} : vector<8x256xbf16> to vector<4x256xbf16>
    %77 = tpu.concatenate %68, %69, %70, %71, %72, %73, %74, %75, %76 in 0 : vector<4x256xbf16>, vector<4x256xbf16>, vector<4x256xbf16>, vector<4x256xbf16>, vector<4x256xbf16>, vector<4x256xbf16>, vector<4x256xbf16>, vector<4x256xbf16>, vector<4x256xbf16> -> vector<36x256xbf16>
    %cst_22 = arith.constant dense<0.000000e+00> : vector<4x256xf32>
    %78 = tpu.matmul %65, %77, %cst_22 {dimension_numbers = #tpu.dot_dimension_numbers<[1], [0], [0], [1], [0, 0, 1, 1], [], []>} : vector<4x36xbf16>, vector<36x256xbf16>, vector<4x256xf32> -> vector<4x256xf32>
    %79 = vector.broadcast %66 : vector<4x1xf32> to vector<4x256xf32>
    %80 = arith.addf %78, %79 : vector<4x256xf32>
    %cst_23 = arith.constant 5.000000e-01 : f32
    %81 = vector.broadcast %cst_23 : f32 to vector<4x256xf32>
    %82 = arith.mulf %81, %80 : vector<4x256xf32>
    %cst_24 = arith.constant 4.471500e-02 : f32
    %83 = vector.broadcast %cst_24 : f32 to vector<4x256xf32>
    %84 = arith.mulf %83, %80 : vector<4x256xf32>
    %85 = arith.mulf %84, %80 : vector<4x256xf32>
    %86 = arith.mulf %85, %80 : vector<4x256xf32>
    %87 = arith.addf %80, %86 : vector<4x256xf32>
    %cst_25 = arith.constant 0.797884583 : f32
    %88 = vector.broadcast %cst_25 : f32 to vector<4x256xf32>
    %89 = arith.mulf %88, %87 : vector<4x256xf32>
    %90 = math.tanh %89 : vector<4x256xf32>
    %cst_26 = arith.constant 1.000000e+00 : f32
    %91 = vector.broadcast %cst_26 : f32 to vector<4x256xf32>
    %92 = arith.addf %91, %90 : vector<4x256xf32>
    %93 = arith.mulf %82, %92 : vector<4x256xf32>
    %94 = arith.mulf %93, %67 : vector<4x256xf32>
    %cst_27 = arith.constant dense<0.000000e+00> : vector<4xf32>
    %95 = vector.multi_reduction <add>, %94, %cst_27 [1] : vector<4x256xf32> to vector<4xf32>
    %96 = vector.shape_cast %95 : vector<4xf32> to vector<4x1xf32>
    %cst_28 = arith.constant dense<0.000000e+00> : vector<1xf32>
    %97 = vector.multi_reduction <add>, %96, %cst_28 [0] : vector<4x1xf32> to vector<1xf32>
    %98 = vector.shape_cast %97 : vector<1xf32> to vector<1x1xf32>
    %c0_29 = arith.constant 0 : index
    %99 = memref.load %arg5[%c0_29] : memref<3xf32, #tpu.memory_space<smem>>
    %100 = vector.broadcast %99 : f32 to vector<1x1xf32>
    %101 = arith.addf %98, %100 : vector<1x1xf32>
    %cst_30 = arith.constant 5.000000e-01 : f32
    %102 = vector.broadcast %cst_30 : f32 to vector<1x1xf32>
    %103 = arith.mulf %102, %101 : vector<1x1xf32>
    %cst_31 = arith.constant 4.471500e-02 : f32
    %104 = vector.broadcast %cst_31 : f32 to vector<1x1xf32>
    %105 = arith.mulf %104, %101 : vector<1x1xf32>
    %106 = arith.mulf %105, %101 : vector<1x1xf32>
    %107 = arith.mulf %106, %101 : vector<1x1xf32>
    %108 = arith.addf %101, %107 : vector<1x1xf32>
    %cst_32 = arith.constant 0.797884583 : f32
    %109 = vector.broadcast %cst_32 : f32 to vector<1x1xf32>
    %110 = arith.mulf %109, %108 : vector<1x1xf32>
    %111 = math.tanh %110 : vector<1x1xf32>
    %cst_33 = arith.constant 1.000000e+00 : f32
    %112 = vector.broadcast %cst_33 : f32 to vector<1x1xf32>
    %113 = arith.addf %112, %111 : vector<1x1xf32>
    %114 = arith.mulf %103, %113 : vector<1x1xf32>
    %c1 = arith.constant 1 : index
    %115 = memref.load %arg5[%c1] : memref<3xf32, #tpu.memory_space<smem>>
    %116 = vector.broadcast %115 : f32 to vector<1x1xf32>
    %117 = arith.mulf %114, %116 : vector<1x1xf32>
    %c2 = arith.constant 2 : index
    %118 = memref.load %arg5[%c2] : memref<3xf32, #tpu.memory_space<smem>>
    %119 = vector.broadcast %118 : f32 to vector<1x1xf32>
    %120 = arith.addf %117, %119 : vector<1x1xf32>
    %c0_34 = arith.constant 0 : index
    %c0_35 = arith.constant 0 : index
    %c0_36 = arith.constant 0 : index
    %121 = vector.load %arg6[%c0_34, %c0_35, %c0_36] : memref<2x1x1xf32, #tpu.memory_space<vmem>>, vector<1x1x1xf32>
    %122 = vector.shape_cast %121 : vector<1x1x1xf32> to vector<1x1xf32>
    %123 = vector.shape_cast %120 : vector<1x1xf32> to vector<1x1x1xf32>
    tpu.vector_store %arg6[%c0_34, %c0_35, %c0_36], %123 {strides = array<i32>} : memref<2x1x1xf32, #tpu.memory_space<vmem>>, vector<1x1x1xf32>,
    %124 = vector.extract_strided_slice %39 {offsets = [4, 0], sizes = [4, 256], strides = [1, 1]} : vector<8x256xbf16> to vector<4x256xbf16>
    %125 = vector.extract_strided_slice %41 {offsets = [4, 0], sizes = [4, 256], strides = [1, 1]} : vector<8x256xbf16> to vector<4x256xbf16>
    %126 = vector.extract_strided_slice %45 {offsets = [4, 0], sizes = [4, 256], strides = [1, 1]} : vector<8x256xbf16> to vector<4x256xbf16>
    %127 = vector.extract_strided_slice %49 {offsets = [4, 0], sizes = [4, 256], strides = [1, 1]} : vector<8x256xbf16> to vector<4x256xbf16>
    %128 = vector.extract_strided_slice %50 {offsets = [4, 0], sizes = [4, 256], strides = [1, 1]} : vector<8x256xbf16> to vector<4x256xbf16>
    %129 = vector.extract_strided_slice %54 {offsets = [4, 0], sizes = [4, 256], strides = [1, 1]} : vector<8x256xbf16> to vector<4x256xbf16>
    %130 = vector.extract_strided_slice %58 {offsets = [4, 0], sizes = [4, 256], strides = [1, 1]} : vector<8x256xbf16> to vector<4x256xbf16>
    %131 = vector.extract_strided_slice %60 {offsets = [4, 0], sizes = [4, 256], strides = [1, 1]} : vector<8x256xbf16> to vector<4x256xbf16>
    %132 = vector.extract_strided_slice %64 {offsets = [4, 0], sizes = [4, 256], strides = [1, 1]} : vector<8x256xbf16> to vector<4x256xbf16>
    %133 = tpu.concatenate %124, %125, %126, %127, %128, %129, %130, %131, %132 in 0 : vector<4x256xbf16>, vector<4x256xbf16>, vector<4x256xbf16>, vector<4x256xbf16>, vector<4x256xbf16>, vector<4x256xbf16>, vector<4x256xbf16>, vector<4x256xbf16>, vector<4x256xbf16> -> vector<36x256xbf16>
    %cst_37 = arith.constant dense<0.000000e+00> : vector<4x256xf32>
    %134 = tpu.matmul %65, %133, %cst_37 {dimension_numbers = #tpu.dot_dimension_numbers<[1], [0], [0], [1], [0, 0, 1, 1], [], []>} : vector<4x36xbf16>, vector<36x256xbf16>, vector<4x256xf32> -> vector<4x256xf32>
    %135 = vector.broadcast %66 : vector<4x1xf32> to vector<4x256xf32>
    %136 = arith.addf %134, %135 : vector<4x256xf32>
    %cst_38 = arith.constant 5.000000e-01 : f32
    %137 = vector.broadcast %cst_38 : f32 to vector<4x256xf32>
    %138 = arith.mulf %137, %136 : vector<4x256xf32>
    %cst_39 = arith.constant 4.471500e-02 : f32
    %139 = vector.broadcast %cst_39 : f32 to vector<4x256xf32>
    %140 = arith.mulf %139, %136 : vector<4x256xf32>
    %141 = arith.mulf %140, %136 : vector<4x256xf32>
    %142 = arith.mulf %141, %136 : vector<4x256xf32>
    %143 = arith.addf %136, %142 : vector<4x256xf32>
    %cst_40 = arith.constant 0.797884583 : f32
    %144 = vector.broadcast %cst_40 : f32 to vector<4x256xf32>
    %145 = arith.mulf %144, %143 : vector<4x256xf32>
    %146 = math.tanh %145 : vector<4x256xf32>
    %cst_41 = arith.constant 1.000000e+00 : f32
    %147 = vector.broadcast %cst_41 : f32 to vector<4x256xf32>
    %148 = arith.addf %147, %146 : vector<4x256xf32>
    %149 = arith.mulf %138, %148 : vector<4x256xf32>
    %150 = arith.mulf %149, %67 : vector<4x256xf32>
    %cst_42 = arith.constant dense<0.000000e+00> : vector<4xf32>
    %151 = vector.multi_reduction <add>, %150, %cst_42 [1] : vector<4x256xf32> to vector<4xf32>
    %152 = vector.shape_cast %151 : vector<4xf32> to vector<4x1xf32>
    %cst_43 = arith.constant dense<0.000000e+00> : vector<1xf32>
    %153 = vector.multi_reduction <add>, %152, %cst_43 [0] : vector<4x1xf32> to vector<1xf32>
    %154 = vector.shape_cast %153 : vector<1xf32> to vector<1x1xf32>
    %c0_44 = arith.constant 0 : index
    %155 = memref.load %arg5[%c0_44] : memref<3xf32, #tpu.memory_space<smem>>
    %156 = vector.broadcast %155 : f32 to vector<1x1xf32>
    %157 = arith.addf %154, %156 : vector<1x1xf32>
    %cst_45 = arith.constant 5.000000e-01 : f32
    %158 = vector.broadcast %cst_45 : f32 to vector<1x1xf32>
    %159 = arith.mulf %158, %157 : vector<1x1xf32>
    %cst_46 = arith.constant 4.471500e-02 : f32
    %160 = vector.broadcast %cst_46 : f32 to vector<1x1xf32>
    %161 = arith.mulf %160, %157 : vector<1x1xf32>
    %162 = arith.mulf %161, %157 : vector<1x1xf32>
    %163 = arith.mulf %162, %157 : vector<1x1xf32>
    %164 = arith.addf %157, %163 : vector<1x1xf32>
    %cst_47 = arith.constant 0.797884583 : f32
    %165 = vector.broadcast %cst_47 : f32 to vector<1x1xf32>
    %166 = arith.mulf %165, %164 : vector<1x1xf32>
    %167 = math.tanh %166 : vector<1x1xf32>
    %cst_48 = arith.constant 1.000000e+00 : f32
    %168 = vector.broadcast %cst_48 : f32 to vector<1x1xf32>
    %169 = arith.addf %168, %167 : vector<1x1xf32>
    %170 = arith.mulf %159, %169 : vector<1x1xf32>
    %c1_49 = arith.constant 1 : index
    %171 = memref.load %arg5[%c1_49] : memref<3xf32, #tpu.memory_space<smem>>
    %172 = vector.broadcast %171 : f32 to vector<1x1xf32>
    %173 = arith.mulf %170, %172 : vector<1x1xf32>
    %c2_50 = arith.constant 2 : index
    %174 = memref.load %arg5[%c2_50] : memref<3xf32, #tpu.memory_space<smem>>
    %175 = vector.broadcast %174 : f32 to vector<1x1xf32>
    %176 = arith.addf %173, %175 : vector<1x1xf32>
    %c1_51 = arith.constant 1 : index
    %c0_52 = arith.constant 0 : index
    %c0_53 = arith.constant 0 : index
    %177 = vector.load %arg6[%c1_51, %c0_52, %c0_53] : memref<2x1x1xf32, #tpu.memory_space<vmem>>, vector<1x1x1xf32>
    %178 = vector.shape_cast %177 : vector<1x1x1xf32> to vector<1x1xf32>
    %179 = vector.shape_cast %176 : vector<1x1xf32> to vector<1x1x1xf32>
    tpu.vector_store %arg6[%c1_51, %c0_52, %c0_53], %179 {strides = array<i32>} : memref<2x1x1xf32, #tpu.memory_space<vmem>>, vector<1x1x1xf32>,
    return
  }
  func.func @transform_0(%arg0: i32) -> (i32, i32, i32) {
    %c0_i32 = arith.constant 0 : i32
    %c0_i32_0 = arith.constant 0 : i32
    %c0_i32_1 = arith.constant 0 : i32
    return %arg0, %c0_i32, %c0_i32_0 : i32, i32, i32
  }
  func.func @transform_1(%arg0: i32) -> (i32, i32) {
    %c0_i32 = arith.constant 0 : i32
    %c0_i32_0 = arith.constant 0 : i32
    %c0_i32_1 = arith.constant 0 : i32
    return %c0_i32, %c0_i32_0 : i32, i32
  }
  func.func @transform_2(%arg0: i32) -> (i32, i32) {
    %c0_i32 = arith.constant 0 : i32
    %c0_i32_0 = arith.constant 0 : i32
    %c0_i32_1 = arith.constant 0 : i32
    return %c0_i32, %c0_i32_0 : i32, i32
  }
  func.func @transform_3(%arg0: i32) -> (i32, i32) {
    %c0_i32 = arith.constant 0 : i32
    %c0_i32_0 = arith.constant 0 : i32
    %c0_i32_1 = arith.constant 0 : i32
    return %c0_i32, %c0_i32_0 : i32, i32
  }
  func.func @transform_4(%arg0: i32) -> i32 {
    %c0_i32 = arith.constant 0 : i32
    %c0_i32_0 = arith.constant 0 : i32
    return %c0_i32 : i32
  }
  func.func @transform_5(%arg0: i32) -> (i32, i32, i32) {
    %c0_i32 = arith.constant 0 : i32
    %c0_i32_0 = arith.constant 0 : i32
    %c0_i32_1 = arith.constant 0 : i32
    return %arg0, %c0_i32, %c0_i32_0 : i32, i32, i32
  }
}

</mosaic_0001>

<bundles_post_ra>
// kernel: tpu_custom_call.1
= control target key start
LH: loop header
LB: loop body
LE: loop exit
PB: predicated region body
PF: predicated region fallthrough
CT: control target
= control target key end

     0   :  { %10 = vsyncpa [#allocation3], 0  ;;  %s996_s0 = inlined_call_operand.hbm [shape: f32[2,4,256], index: 0, kind: input, shape index: {}]   ;;  %s997_s1 = inlined_call_operand.vmem [shape: bf16[4,36], index: 1, kind: input, shape index: {}]   ;;  %s998_s2 = inlined_call_operand.vmem [shape: f32[4,1], index: 2, kind: input, shape index: {}]   ;;  %s999_s3 = inlined_call_operand.hbm [shape: f32[4,256], index: 3, kind: input, shape index: {}]   ;;  %s1000_s4 = inlined_call_operand.vmem [shape: f32[3], index: 4, kind: input, shape index: {}]   ;;  %s1001_s5 = inlined_call_operand.vmem [shape: f32[2,1,1], index: 5, kind: output, shape index: {}]  }
   0x1   :  { %11 = vsyncpa [#allocation6], 0  ;;  %s17_s20 = sshll.u32 %s996_s0, 4  ;;  %s18_s20 = int_to_ptr.hbm [resolvable:$true] %s17_s20 }
   0x2   :  { %12 = vsyncpa [#allocation4], 0  ;;  %s772_s21 = smov [#allocation2]   ;;  %s35_s25 = sshll.u32 %s999_s3, 4  ;;  %s36_s25 = int_to_ptr.hbm [resolvable:$true] %s35_s25 }
   0x3   :  { %s19_s22 = sshll.u32 %s772_s21, 4  ;;  %s773_s26 = smov 128   ;;  %s20_s22 = int_to_ptr.vmem [resolvable:$true] %s19_s22 }
   0x4   :  { %s774_s27 = smov 8   ;;  %s775_s28 = smov [#allocation5]  }
   0x5   :  { %25 = dma.hbm_to_vmem [thread:$0]  %s18_s20, 256, %s20_s22, [#allocation3], %s773_s26, %s773_s26, %s774_s27  }
   0x6   :  { %s37_s29 = sshll.u32 %s775_s28, 4  ;;  %s46_s7 = sshll.u32 %s1000_s4, 4  ;;  %s38_s29 = int_to_ptr.vmem [resolvable:$true] %s37_s29  ;;  %s47_s7 = int_to_ptr.vmem [resolvable:$true] %s46_s7 }
   0x7   :  { %40 = dma.hbm_to_vmem [thread:$0]  %s36_s25, 128, %s38_s29, [#allocation6]  }
   0x8   :  { %s776_s0 = smov [#allocation7]  }
   0x9   :  { %49 = dma.vmem_to_smem %s47_s7, 16, %s776_s0, [#allocation4]  }
   0xa   :  { %766 = dma.done.wait [#allocation3], 256  }
   0xb   :  { %767 = vsyncadd [#allocation3], 4294967040 }
   0xc   :  { %768 = dma.done.wait [#allocation6], 128  }
   0xd   :  { %769 = vsyncadd [#allocation6], 4294967168 }
   0xe   :  { %770 = dma.done.wait [#allocation4], 16  }
   0xf   :  { %771 = vsyncadd [#allocation4], 4294967280 }
  0x10   :  { %62 = sfence }
  0x11   :  { %v64_v0 = vld [vmem:[#allocation2] sm:$0xff]  ;;  %v65_v1 = vld [vmem:[#allocation2 + $0x8] sm:$0xff]  ;;  %s777_s3 = smov 113   ;;  %s778_s4 = smov 17   ;;  %v84_v53 = vlaneseq  ;;  %vm341_vm11 = vcmask 1041408   ;;  %vm348_vm14 = vcmask 1043456  }
  0x12   :  { %v68_v2 = vmul.f32 0.044715, %v64_v0  ;;  %v69_v3 = vmul.f32 0.044715, %v65_v1  ;;  %v66_v12 = vmul.f32 0.5, %v64_v0  ;;  %v67_v14 = vmul.f32 0.5, %v65_v1 }
  0x13   :  { %s779_s8 = smov 127   ;;  %s780_s9 = smov 15   ;;  %v842_v54 = vand.u32 127, %v84_v53  ;;  %vm353_vm15 = vcmask 1045504  }
  0x14   :  { %v70_v4 = vmul.f32 %v68_v2, %v64_v0  ;;  %v71_v5 = vmul.f32 %v69_v3, %v65_v1  ;;  %s781_s10 = smov 97   ;;  %s782_s11 = smov 31  }
  0x15   :  { %s783_s12 = smov 112   ;;  %s784_s13 = smov 111   ;;  %v86_v57 = vadd.s32 128, %v842_v54  ;;  %vm174_vm0 = vcmp.lt.s32.totalorder %v842_v54, 15  ;;  %v91_v61 = vand.u32 15, %v842_v54  ;;  %vm230_vm1 = vcmp.lt.s32.totalorder %v842_v54, 127 }
  0x16   :  { %v72_v6 = vmul.f32 %v70_v4, %v64_v0  ;;  %v73_v7 = vmul.f32 %v71_v5, %v65_v1  ;;  %s785_s14 = smov 1   ;;  %s786_s15 = smov 16   ;;  %vm264_vm4 = vcmp.lt.s32.totalorder %v842_v54, 112  ;;  %vm205_vm5 = vcmp.lt.s32.totalorder %v842_v54, 113 }
  0x17   :  { %v98_v62 = vand.u32 15, %v86_v57  ;;  %vm856_vm2 = vcmp.eq.s32.totalorder %v91_v61, 15  ;;  %vm247_vm6 = vcmp.lt.s32.totalorder %v842_v54, 97  ;;  %vm881_vm7 = vcmp.eq.s32.totalorder %v91_v61, 0  ;;  %v286_v57 = vld [vmem:[%s998_s2] sm:$0xf] }
  0x18   :  { %v74_v8 = vadd.f32 %v72_v6, %v64_v0  ;;  %v75_v9 = vadd.f32 %v73_v7, %v65_v1  ;;  %vm128_vm9 = vcmp.lt.s32.totalorder %v842_v54, 17  ;;  %vm279_vm10 = vcmp.lt.s32.totalorder %v842_v54, 111  ;;  %s615_s19 = sld [smem:[#allocation7 + $0x1]] }
  0x19   :  { %vm860_vm3 = vcmp.eq.s32.totalorder %v98_v62, 15  ;;  %vm885_vm8 = vcmp.eq.s32.totalorder %v98_v62, 0  ;;  %vm188_vm12 = vcmp.lt.s32.totalorder %v842_v54, 31  ;;  %vm142_vm13 = vcmp.lt.s32.totalorder %v842_v54, 1  ;;  %s616_s20 = sld [smem:[#allocation7 + $0x2]] }
  0x1a   :  { %v76_v10 = vmul.f32 0.7978846, %v74_v8  ;;  %v77_v11 = vmul.f32 0.7978846, %v75_v9  ;;  %v787_v62 = vmov 0  }
  0x1b   :  { %688 = vset.pattern.permute.xlu1 %v787_v62  ;;  %689 = vset.pattern.permute.xlu0 %v787_v62 }
  0x1c   :  { %690 = vtanh.f32 %v76_v10 }
  0x1d   :  { %692 = vtanh.f32 %v77_v11 }
  0x22   :  { %v691_v13 = vpop.eup %690 }
  0x23   :  { %v693_v15 = vpop.eup %692  ;;  %v80_v16 = vadd.f32 1.0, %v691_v13 }
  0x24   :  { %v81_v17 = vadd.f32 1.0, %v693_v15 }
  0x25   :  { %v82_v18 = vmul.f32 %v80_v16, %v66_v12 }
  0x26   :  { %v83_v19 = vmul.f32 %v81_v17, %v67_v14 }
  0x27   :  { %117 = vst [vmem:[#allocation1] ss:$2 sm:$0xff] %v82_v18 }
  0x28   :  { %119 = vst [vmem:[#allocation1 + $0x1] ss:$2 sm:$0xff] %v83_v19 }
  0x2f   :  { %v120_v20 = vld.sshfl [vmem:[#allocation1] sm:$0xff pattern:$0x75316420]  ;;  %v121_v21 = vld.sshfl [vmem:[#allocation1 + $0x8] sm:$0xff pattern:$0x75316420] }
  0x30   :  { %131 = vst [vmem:[#allocation1] ss:$2 sm:$0xff] %v82_v18  ;;  %v638_v35 = vpack.i.bf16 %v121_v21, %v120_v20 }
  0x31   :  { %133 = vst [vmem:[#allocation1 + $0x1] ss:$2 sm:$0xff] %v83_v19 }
  0x32   :  { %639 = vrot.lane.b32.xlu2 %v638_v35, %s778_s4 }
  0x38   :  { %v827_v22 = vld.sshfl [vmem:[#allocation1] sm:$0xff pattern:$0x75316420]  ;;  %v829_v23 = vld.sshfl [vmem:[#allocation1 + $0x8] sm:$0xff pattern:$0x75316420] }
  0x39   :  { %148 = vst [vmem:[#allocation1] ss:$2 sm:$0xff] %v82_v18  ;;  %v668_v50 = vpack.i.bf16 %v829_v23, %v827_v22 }
  0x3a   :  { %150 = vst [vmem:[#allocation1 + $0x1] ss:$2 sm:$0xff] %v83_v19 }
  0x41   :  { %v831_v24 = vld.sshfl [vmem:[#allocation1] sm:$0xff pattern:$0x75316420]  ;;  %v152_v25 = vld.sshfl [vmem:[#allocation1 + $0x8] sm:$0xff pattern:$0x75316420] }
  0x42   :  { %163 = vst [vmem:[#allocation1] ss:$2 sm:$0xff] %v82_v18  ;;  %v683_v51 = vpack.i.bf16 %v152_v25, %v831_v24 }
  0x43   :  { %165 = vst [vmem:[#allocation1 + $0x1] ss:$2 sm:$0xff] %v83_v19 }
  0x4a   :  { %v166_v26 = vld.sshfl [vmem:[#allocation1] sm:$0xff pattern:$0x75316420]  ;;  %v167_v27 = vld.sshfl [vmem:[#allocation1 + $0x8] sm:$0xff pattern:$0x75316420] }
  0x4b   :  { %177 = vst [vmem:[#allocation1] ss:$2 sm:$0xff] %v82_v18  ;;  %v643_v39 = vpack.i.bf16 %v167_v27, %v166_v26 }
  0x4c   :  { %179 = vst [vmem:[#allocation1 + $0x1] ss:$2 sm:$0xff] %v83_v19 }
  0x4d   :  { %644 = vrot.lane.b32.xlu2 %v643_v39, %s780_s9 }
  0x53   :  { %v180_v28 = vld.sshfl [vmem:[#allocation1] sm:$0xff pattern:$0x75316420]  ;;  %v181_v29 = vld.sshfl [vmem:[#allocation1 + $0x8] sm:$0xff pattern:$0x75316420] }
  0x54   :  { %194 = vst [vmem:[#allocation1] ss:$2 sm:$0xff] %v82_v18  ;;  %v673_v43 = vpack.i.bf16 %v181_v29, %v180_v28 }
  0x55   :  { %196 = vst [vmem:[#allocation1 + $0x1] ss:$2 sm:$0xff] %v83_v19 }
  0x5c   :  { %v197_v30 = vld.sshfl [vmem:[#allocation1] sm:$0xff pattern:$0x75316420]  ;;  %v198_v31 = vld.sshfl [vmem:[#allocation1 + $0x8] sm:$0xff pattern:$0x75316420] }
  0x5d   :  { %v648_v32 = vpack.i.bf16 %v198_v31, %v197_v30  ;;  %211 = vst [vmem:[#allocation1] ss:$2 sm:$0xff] %v82_v18 }
  0x5e   :  { %213 = vst [vmem:[#allocation1 + $0x1] ss:$2 sm:$0xff] %v83_v19 }
  0x5f   :  { %649 = vrot.lane.b32.xlu1 %v648_v32, %s777_s3 }
  0x65   :  { %v833_v33 = vld.sshfl [vmem:[#allocation1] sm:$0xff pattern:$0x75316420]  ;;  %v835_v34 = vld.sshfl [vmem:[#allocation1 + $0x8] sm:$0xff pattern:$0x75316420] }
  0x66   :  { %219 = vst [vmem:[#allocation1] ss:$2 sm:$0xff] %v82_v18  ;;  %v218_v17 = vpack.c.bf16 %v835_v34, %v833_v33 }
  0x67   :  { %221 = vst [vmem:[#allocation1 + $0x1] ss:$2 sm:$0xff] %v83_v19 }
  0x68   :  { %v313_v28 = vunpack.c.l.b16 %v218_v17  ;;  %v314_v35 = vunpack.c.h.b16 %v218_v17 }
  0x6e   :  { %v222_v36 = vld.sshfl [vmem:[#allocation1] sm:$0xff pattern:$0x75316420]  ;;  %v223_v37 = vld.sshfl [vmem:[#allocation1 + $0x8] sm:$0xff pattern:$0x75316420] }
  0x6f   :  { %236 = vst [vmem:[#allocation1] ss:$2 sm:$0xff] %v82_v18  ;;  %v653_v38 = vpack.i.bf16 %v223_v37, %v222_v36  ;;  %v315_v36 = vpack.c.b16 %v313_v28, %v313_v28 }
  0x70   :  { %238 = vst [vmem:[#allocation1 + $0x1] ss:$2 sm:$0xff] %v83_v19 }
  0x71   :  { %654 = vrot.lane.b32.xlu0 %v653_v38, %s779_s8 }
  0x77   :  { %v239_v40 = vld.sshfl [vmem:[#allocation1] sm:$0xff pattern:$0x75316420]  ;;  %v240_v41 = vld.sshfl [vmem:[#allocation1 + $0x8] sm:$0xff pattern:$0x75316420] }
  0x78   :  { %v658_v42 = vpack.i.bf16 %v240_v41, %v239_v40  ;;  %253 = vst [vmem:[#allocation1] ss:$2 sm:$0xff] %v82_v18 }
  0x79   :  { %255 = vst [vmem:[#allocation1 + $0x1] ss:$2 sm:$0xff] %v83_v19 }
  0x7a   :  { %659 = vrot.lane.b32.xlu1 %v658_v42, %s781_s10 }
  0x80   :  { %v256_v44 = vld.sshfl [vmem:[#allocation1] sm:$0xff pattern:$0x75316420]  ;;  %v257_v45 = vld.sshfl [vmem:[#allocation1 + $0x8] sm:$0xff pattern:$0x75316420] }
  0x81   :  { %268 = vst [vmem:[#allocation1] ss:$2 sm:$0xff] %v82_v18  ;;  %v678_v46 = vpack.i.bf16 %v257_v45, %v256_v44  ;;  %v316_v44 = vpack.c.b16 %v314_v35, %v314_v35 }
  0x82   :  { %270 = vst [vmem:[#allocation1 + $0x1] ss:$2 sm:$0xff] %v83_v19  ;;  %674 = vrot.lane.b32.xlu1 %v673_v43, %s782_s11 }
  0x83   :  { %679 = vrot.lane.b32.xlu2 %v678_v46, %s783_s12 }
  0x89   :  { %v271_v47 = vld.sshfl [vmem:[#allocation1] sm:$0xff pattern:$0x75316420]  ;;  %v272_v48 = vld.sshfl [vmem:[#allocation1 + $0x8] sm:$0xff pattern:$0x75316420] }
  0x8a   :  { %v663_v49 = vpack.i.bf16 %v272_v48, %v271_v47  ;;  %v479_v48 = vrot.slane %v315_v36, 2  ;;  %378 = vperm.xlu1 %688, %v286_v57  }
  0x8c   :  { %664 = vrot.lane.b32.xlu0 %v663_v49, %s784_s13  ;;  %v840_v52 = vpop.permute.xlu2 %639 }
  0x8d   :  { %v642_v31 = vunpack.i.h.bf16 %v840_v52  ;;  %v641_v32 = vunpack.i.l.bf16 %v840_v52 }
  0x8f   :  { %v898_v40 = vsel %vm128_vm9, %v641_v32, %v642_v31  ;;  %v900_v43 = vsel %vm128_vm9, %v642_v31, %v641_v32 }
  0x94   :  { %669 = vrot.lane.b32.xlu0 %v668_v50, %s785_s14 }
  0x9c   :  { %684 = vrot.lane.b32.xlu0 %v683_v51, %s786_s15 }
  0xa7   :  { %v645_v55 = vpop.permute.xlu2 %644 }
  0xa8   :  { %v647_v59 = vunpack.i.h.bf16 %v645_v55  ;;  %v646_v60 = vunpack.i.l.bf16 %v645_v55 }
  0xaa   :  { %v848_v1 = vsel %vm174_vm0, %v646_v60, %v647_v59  ;;  %v850_v2 = vsel %vm174_vm0, %v647_v59, %v646_v60  ;;  %vm159_vm0 = vcmp.lt.s32.totalorder %v842_v54, 16 }
  0xd1   :  { %v650_v56 = vpop.permute.xlu1 %649 }
  0xd2   :  { %v652_v13 = vunpack.i.h.bf16 %v650_v56  ;;  %v651_v14 = vunpack.i.l.bf16 %v650_v56 }
  0xd4   :  { %v877_v21 = vsel %vm205_vm5, %v651_v14, %v652_v13  ;;  %v879_v22 = vsel %vm205_vm5, %v652_v13, %v651_v14 }
  0xdd   :  { %v680_v3 = vpop.permute.xlu2 %679 }
  0xde   :  { %v682_v9 = vunpack.i.h.bf16 %v680_v3  ;;  %v681_v10 = vunpack.i.l.bf16 %v680_v3  ;;  %v480_v3 = vrot.slane %v316_v44, 2 }
  0xe0   :  { %v265_v18 = vsel %vm264_vm4, %v681_v10, %v682_v9  ;;  %v266_v19 = vsel %vm264_vm4, %v682_v9, %v681_v10 }
  0xe1   :  { %v267_v27 = vpack.c.bf16 %v266_v19, %v265_v18 }
  0xe3   :  { %v655_v58 = vpop.permute.xlu0 %654  ;;  %v330_v37 = vunpack.c.l.b16 %v267_v27  ;;  %v331_v42 = vunpack.c.h.b16 %v267_v27 }
  0xe4   :  { %v657_v63 = vunpack.i.h.bf16 %v655_v58  ;;  %v656_v0 = vunpack.i.l.bf16 %v655_v58 }
  0xe5   :  { %v905_v47 = vpack.c.b16 %v330_v37, %v330_v37  ;;  %v907_v56 = vpack.c.b16 %v331_v42, %v331_v42 }
  0xe6   :  { %v852_v4 = vsel %vm230_vm1, %v656_v0, %v657_v63  ;;  %v854_v5 = vsel %vm230_vm1, %v657_v63, %v656_v0  ;;  %vm381_vm1 = vcmask 293888  }
  0xe7   :  { %v233_v11 = vsel %vm856_vm2, %v850_v2, %v852_v4  ;;  %v234_v12 = vsel %vm860_vm3, %v848_v1, %v854_v5  ;;  %v335_v14 = vrot.slane %v907_v56, 2 }
  0xe8   :  { %v235_v20 = vpack.c.bf16 %v234_v12, %v233_v11  ;;  %v334_v12 = vrot.slane %v905_v47, 2 }
  0xea   :  { %v318_v29 = vunpack.c.l.b16 %v235_v20  ;;  %v319_v30 = vunpack.c.h.b16 %v235_v20 }
  0xec   :  { %v660_v8 = vpop.permute.xlu1 %659  ;;  %v320_v38 = vpack.c.b16 %v318_v29, %v318_v29  ;;  %v321_v39 = vpack.c.b16 %v319_v30, %v319_v30 }
  0xed   :  { %v662_v15 = vunpack.i.h.bf16 %v660_v8  ;;  %v661_v16 = vunpack.i.l.bf16 %v660_v8 }
  0xee   :  { %v322_v51 = vrot.slane %v320_v38, 6  ;;  %v323_v52 = vrot.slane %v321_v39, 6  ;;  %v503_v20 = vsel %vm341_vm11, %v479_v48, %v320_v38 }
  0xef   :  { %v248_v25 = vsel %vm247_vm6, %v661_v16, %v662_v15  ;;  %v249_v26 = vsel %vm247_vm6, %v662_v15, %v661_v16 }
  0xf0   :  { %v250_v33 = vsel %vm881_vm7, %v248_v25, %v877_v21  ;;  %v251_v34 = vsel %vm885_vm8, %v249_v26, %v879_v22  ;;  %v362_v9 = vsel %vm341_vm11, %v315_v36, %v322_v51  ;;  %v365_v10 = vsel %vm341_vm11, %v316_v44, %v323_v52 }
  0xf1   :  { %v252_v41 = vpack.c.bf16 %v251_v34, %v250_v33  ;;  %v506_v25 = vsel %vm341_vm11, %v480_v3, %v321_v39 }
  0xf3   :  { %v325_v53 = vunpack.c.l.b16 %v252_v41  ;;  %v326_v55 = vunpack.c.h.b16 %v252_v41 }
  0xf4   :  { %v675_v46 = vpop.permute.xlu1 %674 }
  0xf5   :  { %v677_v60 = vunpack.i.h.bf16 %v675_v46  ;;  %v676_v61 = vunpack.i.l.bf16 %v675_v46  ;;  %v327_v11 = vpack.c.b16 %v325_v53, %v325_v53  ;;  %v328_v13 = vpack.c.b16 %v326_v55, %v326_v55 }
  0xf7   :  { %v367_v18 = vsel %vm348_vm14, %v362_v9, %v327_v11  ;;  %v369_v19 = vsel %vm348_vm14, %v365_v10, %v328_v13  ;;  %v481_v32 = vrot.slane %v327_v11, 6  ;;  %v482_v33 = vrot.slane %v328_v13, 6 }
  0xf9   :  { %v508_v46 = vsel %vm348_vm14, %v503_v20, %v481_v32  ;;  %v510_v48 = vsel %vm348_vm14, %v506_v25, %v482_v33 }
  0xfa   :  { %v512_v53 = vsel %vm353_vm15, %v508_v46, %v905_v47  ;;  %v515_v55 = vsel %vm353_vm15, %v510_v48, %v907_v56 }
  0xfe   :  { %v665_v45 = vpop.permute.xlu0 %664 }
  0xff   :  { %v667_v49 = vunpack.i.h.bf16 %v665_v45  ;;  %v666_v50 = vunpack.i.l.bf16 %v665_v45  ;;  %v374_v45 = vsel %vm353_vm15, %v369_v19, %v335_v14 }
 0x101   :  { %v280_v58 = vsel %vm279_vm10, %v666_v50, %v667_v49  ;;  %v281_v59 = vsel %vm279_vm10, %v667_v49, %v666_v50 }
 0x102   :  { %v282_v63 = vsel %vm856_vm2, %v852_v4, %v280_v58  ;;  %v283_v0 = vsel %vm860_vm3, %v854_v5, %v281_v59  ;;  %v189_v4 = vsel %vm188_vm12, %v676_v61, %v677_v60  ;;  %v190_v5 = vsel %vm188_vm12, %v677_v60, %v676_v61 }
 0x103   :  { %v284_v8 = vpack.c.bf16 %v283_v0, %v282_v63  ;;  %v191_v30 = vsel %vm856_vm2, %v190_v5, %v850_v2  ;;  %v192_v31 = vsel %vm860_vm3, %v189_v4, %v848_v1  ;;  %vm473_vm2 = vcmask 0  }
 0x104   :  { %v193_v39 = vpack.c.bf16 %v192_v31, %v191_v30  ;;  %v285_v31 = vld [vmem:[%s997_s1] sm:$0x3]  ;;  %s455_s1 = sld [smem:[#allocation7]] }
 0x105   :  { %v337_v15 = vunpack.c.l.b16 %v284_v8  ;;  %v338_v16 = vunpack.c.h.b16 %v284_v8 }
 0x106   :  { %v670_v17 = vpop.permute.xlu0 %669  ;;  %v301_v51 = vunpack.c.l.b16 %v193_v39  ;;  %v302_v52 = vunpack.c.h.b16 %v193_v39 }
 0x107   :  { %v672_v26 = vunpack.i.h.bf16 %v670_v17  ;;  %v671_v27 = vunpack.i.l.bf16 %v670_v17  ;;  %v339_v28 = vpack.c.b16 %v337_v15, %v337_v15  ;;  %v340_v29 = vpack.c.b16 %v338_v16, %v338_v16 }
 0x108   :  { %v303_v63 = vpack.c.b16 %v301_v51, %v301_v51  ;;  %v304_v0 = vpack.c.b16 %v302_v52, %v302_v52 }
 0x109   :  { %v143_v34 = vsel %vm142_vm13, %v671_v27, %v672_v26  ;;  %v144_v35 = vsel %vm142_vm13, %v672_v26, %v671_v27  ;;  %v386_v36 = vsel %vm341_vm11, %v339_v28, 0  ;;  %v389_v37 = vsel %vm341_vm11, %v340_v29, 0 }
 0x10a   :  { %v145_v2 = vsel %vm881_vm7, %v144_v35, %v900_v43  ;;  %v146_v1 = vsel %vm885_vm8, %v143_v34, %v898_v40  ;;  %396 = vmatpush.bf16.msra.mxu0 %v386_v36  ;;  %409 = vmatpush.bf16.msra.mxu1 %v389_v37  ;;  %v483_v6 = vrot.slane %v339_v28, 2  ;;  %v484_v7 = vrot.slane %v340_v29, 2  ;;  %v379_v37 = vpop.permute.xlu1 %378 }
 0x10b   :  { %v147_v38 = vpack.c.bf16 %v146_v1, %v145_v2  ;;  %v208_v41 = vsel %vm881_vm7, %v877_v21, %v144_v35  ;;  %v209_v42 = vsel %vm885_vm8, %v879_v22, %v143_v34  ;;  %v371_v40 = vsel %vm353_vm15, %v367_v18, %v334_v12  ;;  %v287_v34 = vld [vmem:[#allocation5] sm:$0xff] }
 0x10c   :  { %v518_v43 = vsel %vm341_vm11, %v483_v6, 0  ;;  %v521_v44 = vsel %vm341_vm11, %v484_v7, 0  ;;  %v210_v23 = vpack.c.bf16 %v209_v42, %v208_v41  ;;  %v477_v56 = vrot.slane %v303_v63, 6  ;;  %436 = vst [vmem:[#allocation1] ss:$2 sm:$0xff] %v287_v34 }
 0x10d   :  { %528 = vmatpush.bf16.msra.mxu2 %v518_v43  ;;  %541 = vmatpush.bf16.msra.mxu3 %v521_v44  ;;  %v289_v21 = vunpack.c.l.b16 %v147_v38  ;;  %v290_v49 = vunpack.c.h.b16 %v147_v38  ;;  %v478_v14 = vrot.slane %v304_v0, 6 }
 0x10e   :  { %v685_v22 = vpop.permute.xlu0 %684  ;;  %397 = vmatpush.bf16.msra.mxu0 %v371_v40  ;;  %410 = vmatpush.bf16.msra.mxu1 %v374_v45  ;;  %v306_v59 = vunpack.c.l.b16 %v210_v23  ;;  %v307_v60 = vunpack.c.h.b16 %v210_v23 }
 0x10f   :  { %v687_v24 = vunpack.i.h.bf16 %v685_v22  ;;  %v686_v50 = vunpack.i.l.bf16 %v685_v22  ;;  %v291_v61 = vpack.c.b16 %v289_v21, %v289_v21  ;;  %v292_v62 = vpack.c.b16 %v290_v49, %v290_v49 }
 0x110   :  { %v308_v9 = vpack.c.b16 %v306_v59, %v306_v59  ;;  %v309_v10 = vpack.c.b16 %v307_v60, %v307_v60 }
 0x111   :  { %v160_v57 = vsel %vm159_vm0, %v686_v50, %v687_v24  ;;  %v161_v58 = vsel %vm159_vm0, %v687_v24, %v686_v50  ;;  %529 = vmatpush.bf16.msra.mxu2 %v512_v53  ;;  %542 = vmatpush.bf16.msra.mxu3 %v515_v55  ;;  %v475_v47 = vrot.slane %v291_v61, 2  ;;  %v476_v13 = vrot.slane %v292_v62, 2 }
 0x112   :  { %v162_v54 = vpack.c.bf16 %v160_v57, %v161_v58  ;;  %v310_v19 = vrot.slane %v308_v9, 2  ;;  %v311_v20 = vrot.slane %v309_v10, 2 }
 0x113   :  { %v437_v35 = vld.sshfl [vmem:[#allocation1] sm:$0xff pattern:$0x75316420]  ;;  %v438_v36 = vld.sshfl [vmem:[#allocation1 + $0x8] sm:$0xff pattern:$0x75316420] }
 0x114   :  { %v294_v3 = vunpack.c.l.b16 %v162_v54  ;;  %v295_v8 = vunpack.c.h.b16 %v162_v54  ;;  %567 = vst [vmem:[#allocation1] ss:$2 sm:$0xff] %v287_v34 }
 0x116   :  { %v296_v11 = vpack.c.b16 %v294_v3, %v294_v3  ;;  %v297_v12 = vpack.c.b16 %v295_v8, %v295_v8 }
 0x118   :  { %v487_v4 = vsel %vm341_vm11, %v475_v47, %v296_v11  ;;  %v490_v5 = vsel %vm341_vm11, %v476_v13, %v297_v12  ;;  %v298_v15 = vrot.slane %v296_v11, 6  ;;  %v299_v16 = vrot.slane %v297_v12, 6 }
 0x119   :  { %v492_v17 = vsel %vm348_vm14, %v487_v4, %v477_v56  ;;  %v494_v18 = vsel %vm348_vm14, %v490_v5, %v478_v14 }
 0x11a   :  { %v496_v25 = vsel %vm353_vm15, %v492_v17, %v308_v9  ;;  %v499_v26 = vsel %vm353_vm15, %v494_v18, %v309_v10  ;;  %v344_v27 = vsel %vm341_vm11, %v291_v61, %v298_v15  ;;  %v347_v28 = vsel %vm341_vm11, %v292_v62, %v299_v16 }
 0x11b   :  { %530 = vmatpush.bf16.msra.mxu2 %v496_v25  ;;  %543 = vmatpush.bf16.msra.mxu3 %v499_v26  ;;  %v350_v29 = vsel %vm348_vm14, %v344_v27, %v303_v63  ;;  %v352_v30 = vsel %vm348_vm14, %v347_v28, %v304_v0  ;;  %v568_v18 = vld.sshfl [vmem:[#allocation1] sm:$0xff pattern:$0x75316420]  ;;  %v569_v25 = vld.sshfl [vmem:[#allocation1 + $0x8] sm:$0xff pattern:$0x75316420] }
 0x11c   :  { %v355_v32 = vsel %vm353_vm15, %v350_v29, %v310_v19  ;;  %v358_v33 = vsel %vm353_vm15, %v352_v30, %v311_v20 }
 0x11d   :  { %398 = vmatpush.bf16.msra.mxu0 %v355_v32  ;;  %411 = vmatpush.bf16.msra.mxu1 %v358_v33 }
 0x11e   :  { %617 = vmatmul.msk.bf16.vlgmr.msra.gmra.mxu2 %vm381_vm1, %v285_v31  ;;  %618 = vmatmul.msk.bf16.vlgmr.msra.gmra.mxu3 %vm381_vm1, %v285_v31 }
 0x120   :  { %613 = vmatmul.msk.bf16.vlgmr.msra.gmra.mxu0 %vm381_vm1, %v285_v31  ;;  %614 = vmatmul.msk.bf16.vlgmr.msra.gmra.mxu1 %vm381_vm1, %v285_v31 }
 0x19d   :  { %v400_v2 = vpop.f32.mrf.mxu0  ;;  %v413_v1 = vpop.f32.mrf.mxu1 }
 0x19e   :  { %v401_v6 = vadd.f32 %v400_v2, %v379_v37  ;;  %v414_v7 = vadd.f32 %v413_v1, %v379_v37 }
 0x1a0   :  { %v419_v38 = vmul.f32 0.044715, %v401_v6  ;;  %v420_v39 = vmul.f32 0.044715, %v414_v7  ;;  %v417_v8 = vmul.f32 0.5, %v401_v6  ;;  %v418_v10 = vmul.f32 0.5, %v414_v7 }
 0x1a1   :  { %v532_v41 = vpop.f32.mrf.mxu2  ;;  %v545_v42 = vpop.f32.mrf.mxu3 }
 0x1a2   :  { %v421_v43 = vmul.f32 %v419_v38, %v401_v6  ;;  %v422_v44 = vmul.f32 %v420_v39, %v414_v7  ;;  %v533_v40 = vadd.f32 %v532_v41, %v379_v37  ;;  %v546_v45 = vadd.f32 %v545_v42, %v379_v37 }
 0x1a4   :  { %v423_v46 = vmul.f32 %v421_v43, %v401_v6  ;;  %v424_v48 = vmul.f32 %v422_v44, %v414_v7  ;;  %v551_v23 = vmul.f32 0.044715, %v533_v40  ;;  %v552_v21 = vmul.f32 0.044715, %v546_v45 }
 0x1a5   :  { %v402_v49 = vpop.f32.mrf.mxu0  ;;  %v415_v22 = vpop.f32.mrf.mxu1  ;;  %v549_v4 = vmul.f32 0.5, %v533_v40  ;;  %v550_v16 = vmul.f32 0.5, %v546_v45  ;;  %v456_v43 = vstv %s455_s1 }
 0x1a6   :  { %v553_v24 = vmul.f32 %v551_v23, %v533_v40  ;;  %v554_v50 = vmul.f32 %v552_v21, %v546_v45  ;;  %v425_v51 = vadd.f32 %v423_v46, %v401_v6  ;;  %v426_v52 = vadd.f32 %v424_v48, %v414_v7 }
 0x1a8   :  { %v555_v53 = vmul.f32 %v553_v24, %v533_v40  ;;  %v556_v55 = vmul.f32 %v554_v50, %v546_v45  ;;  %v427_v57 = vmul.f32 0.7978846, %v425_v51  ;;  %v428_v58 = vmul.f32 0.7978846, %v426_v52 }
 0x1a9   :  { %v534_v59 = vpop.f32.mrf.mxu2  ;;  %v547_v60 = vpop.f32.mrf.mxu3 }
 0x1aa   :  { %694 = vtanh.f32 %v427_v57  ;;  %v557_v54 = vadd.f32 %v555_v53, %v533_v40  ;;  %v558_v61 = vadd.f32 %v556_v55, %v546_v45 }
 0x1ab   :  { %696 = vtanh.f32 %v428_v58 }
 0x1ac   :  { %v559_v62 = vmul.f32 0.7978846, %v557_v54  ;;  %v560_v63 = vmul.f32 0.7978846, %v558_v61  ;;  %v468_v54 = vstv %s615_s19 }
 0x1ae   :  { %698 = vtanh.f32 %v559_v62 }
 0x1af   :  { %700 = vtanh.f32 %v560_v63  ;;  %v471_v63 = vstv %s616_s20 }
 0x1b0   :  { %v695_v0 = vpop.eup %694 }
 0x1b1   :  { %v697_v3 = vpop.eup %696  ;;  %v431_v9 = vadd.f32 1.0, %v695_v0 }
 0x1b2   :  { %v432_v11 = vadd.f32 1.0, %v697_v3 }
 0x1b3   :  { %v433_v47 = vmul.f32 %v431_v9, %v417_v8 }
 0x1b4   :  { %v699_v12 = vpop.eup %698  ;;  %v434_v13 = vmul.f32 %v432_v11, %v418_v10 }
 0x1b5   :  { %v701_v56 = vpop.eup %700  ;;  %v441_v14 = vmul.f32 %v437_v35, %v433_v47  ;;  %v563_v5 = vadd.f32 1.0, %v699_v12 }
 0x1b6   :  { %v442_v15 = vmul.f32 %v438_v36, %v434_v13  ;;  %v564_v17 = vadd.f32 1.0, %v701_v56 }
 0x1b7   :  { %v443_v19 = vsel %vm348_vm14, %v441_v14, 0.0  ;;  %v565_v20 = vmul.f32 %v563_v5, %v549_v4 }
 0x1b8   :  { %v444_v26 = vsel %vm348_vm14, %v442_v15, 0.0  ;;  %v566_v27 = vmul.f32 %v564_v17, %v550_v16 }
 0x1b9   :  { %v445_v28 = vadd.f32 %v444_v26, %v443_v19  ;;  %v572_v29 = vmul.f32 %v568_v18, %v565_v20 }
 0x1ba   :  { %v573_v30 = vmul.f32 %v569_v25, %v566_v27 }
 0x1bb   :  { %446 = vadd.xlane.f32.xlu2 %v445_v28  ;;  %v574_v31 = vsel %vm348_vm14, %v572_v29, 0.0 }
 0x1bc   :  { %v575_v32 = vsel %vm348_vm14, %v573_v30, 0.0 }
 0x1bd   :  { %v576_v33 = vadd.f32 %v575_v32, %v574_v31 }
 0x1bf   :  { %577 = vadd.xlane.f32.xlu0 %v576_v33 }
 0x22e   :  { %v447_v34 = vpop.xlane.xlu2 %446 }
 0x22f   :  { %v448_v35 = vsel %vm348_vm14, %v447_v34, 0.0 }
 0x230   :  { %v449_v36 = vrot.slane %v448_v35, 4 }
 0x232   :  { %v450_v37 = vadd.f32 %v449_v36, %v448_v35  ;;  %v578_v2 = vpop.xlane.xlu0 %577 }
 0x233   :  { %v579_v1 = vsel %vm348_vm14, %v578_v2, 0.0 }
 0x234   :  { %v451_v6 = vrot.slane %v450_v37, 2  ;;  %v580_v7 = vrot.slane %v579_v1, 4 }
 0x236   :  { %v452_v38 = vadd.f32 %v451_v6, %v450_v37  ;;  %v581_v39 = vadd.f32 %v580_v7, %v579_v1 }
 0x238   :  { %v453_v41 = vrot.slane %v452_v38, 1  ;;  %v582_v42 = vrot.slane %v581_v39, 2 }
 0x23a   :  { %v454_v44 = vadd.f32 %v453_v41, %v452_v38  ;;  %v583_v40 = vadd.f32 %v582_v42, %v581_v39 }
 0x23c   :  { %v457_v45 = vadd.f32 %v456_v43, %v454_v44  ;;  %v584_v46 = vrot.slane %v583_v40, 1 }
 0x23e   :  { %v459_v48 = vmul.f32 0.044715, %v457_v45  ;;  %v585_v23 = vadd.f32 %v584_v46, %v583_v40  ;;  %v458_v59 = vmul.f32 0.5, %v457_v45 }
 0x240   :  { %v460_v21 = vmul.f32 %v459_v48, %v457_v45  ;;  %v588_v49 = vadd.f32 %v585_v23, %v456_v43 }
 0x242   :  { %v461_v22 = vmul.f32 %v460_v21, %v457_v45  ;;  %v590_v24 = vmul.f32 0.044715, %v588_v49  ;;  %v589_v3 = vmul.f32 0.5, %v588_v49 }
 0x244   :  { %v462_v50 = vadd.f32 %v461_v22, %v457_v45  ;;  %v591_v51 = vmul.f32 %v590_v24, %v588_v49 }
 0x246   :  { %v463_v52 = vmul.f32 0.7978846, %v462_v50  ;;  %v592_v53 = vmul.f32 %v591_v51, %v588_v49 }
 0x248   :  { %702 = vtanh.f32 %v463_v52  ;;  %v593_v55 = vadd.f32 %v592_v53, %v588_v49 }
 0x24a   :  { %v594_v57 = vmul.f32 0.7978846, %v593_v55 }
 0x24c   :  { %704 = vtanh.f32 %v594_v57 }
 0x24e   :  { %v703_v58 = vpop.eup %702 }
 0x24f   :  { %v465_v60 = vadd.f32 1.0, %v703_v58 }
 0x251   :  { %v466_v61 = vmul.f32 %v465_v60, %v458_v59 }
 0x252   :  { %v705_v62 = vpop.eup %704 }
 0x253   :  { %v469_v0 = vmul.f32 %v468_v54, %v466_v61  ;;  %v596_v8 = vadd.f32 1.0, %v705_v62 }
 0x255   :  { %v472_v9 = vadd.f32 %v471_v63, %v469_v0  ;;  %v597_v10 = vmul.f32 %v596_v8, %v589_v3 }
 0x257   :  { %474 = vst.msk [vmem:[%s1001_s5] sm:$0x1] %vm473_vm2, %v472_v9  ;;  %v600_v11 = vmul.f32 %v597_v10, %v468_v54 }
 0x259   :  { %v603_v47 = vadd.f32 %v600_v11, %v471_v63 }
 0x25b   :  { %621 = vst.msk [vmem:[%s1001_s5 + $0x1] sm:$0x1] %vm473_vm2, %v603_v47 }
 0x25c   :  { %610 = vsyncpa [#allocation3], 1 }
 0x25d   :  { %611 = vsyncpa [#allocation6], 1 }
 0x25e   :  { %612 = vsyncpa [#allocation4], 1 }

</bundles_post_ra>
